<compile_context>
chip_gen: v7x
topology: tpu7x:2x2x1
jax: 0.10.0
libtpu: 0.0.40
codegen_flags: <defaults>
</compile_context>

<pallas_src>
import math
from functools import partial

import jax
import jax.numpy as jnp
import numpy as np
from jax.experimental import pallas as pl
from jax.experimental.pallas import tpu as pltpu

f32 = jnp.float32
bf16 = jnp.bfloat16

WEIGHT_ORDER = (
    "w_fc1", "b_fc1",
    "w_q", "w_k", "w_v",
    "w_d1", "b_d1", "w_d2", "b_d2",
    "w_g1", "b_g1", "w_g2", "b_g2",
    "w_pw", "b_pw", "w_dw", "b_dw",
    "w_fc2", "b_fc2",
)


def _round_up(x, m):
    return ((x + m - 1) // m) * m


def _pick_tile(n, want):
    """Largest multiple-of-8 divisor of n that is <= want (else n)."""
    if n <= want:
        return n
    t = (want // 8) * 8
    while t >= 8:
        if n % t == 0:
            return t
        t -= 8
    return n


# --------------------------------------------------------------------------
# Kernel 1: per-point projections.
#   qx  = [ q | xyz @ W_d1 ]            (f32)
#   kvx = [ k | v | xyz @ W_d1 ]        (f32; cast to bf16 gather source in XLA)
# --------------------------------------------------------------------------
def _proj_kernel(xyz_ref, feat_ref, w_qkv_ref, b_qkv_ref, w_d1_ref,
                 qx_ref, kvx_ref, *, d_model):
    DM = d_model
    feat = feat_ref[0]                                    # (T, P) f32
    xyz = xyz_ref[0]                                      # (T, 3) f32
    # fc1 folded into the fused q/k/v projection.  Exact only because
    # w_q / w_k / w_v are bias-free Linear layers (document the invariant).
    qkv = (jnp.dot(feat, w_qkv_ref[...], preferred_element_type=f32)
           + b_qkv_ref[...])                              # (T, 3*DM)
    # Linear(3, DM) as three VPU multiply-adds (a 3-wide contraction would
    # waste the MXU); the bias b_d1 is added later inside fc_delta.
    w_d1 = w_d1_ref[...]                                  # (3, DM)
    xyzp = (xyz[:, 0:1] * w_d1[0:1, :]
            + xyz[:, 1:2] * w_d1[1:2, :]
            + xyz[:, 2:3] * w_d1[2:3, :])                 # (T, DM)
    qx_ref[0, :, :DM] = qkv[:, :DM]
    qx_ref[0, :, DM:] = xyzp
    kvx_ref[0, :, :2 * DM] = qkv[:, DM:]
    kvx_ref[0, :, 2 * DM:] = xyzp


# --------------------------------------------------------------------------
# Kernel 2: attention over the k pre-gathered neighbours (tile-local, no
# cross-tile scratch -> both grid axes "parallel").
# --------------------------------------------------------------------------
def _attn_kernel(qx_ref, g_ref,
                 b_d1_ref, w_d2_ref, b_d2_ref,
                 w_g1_ref, b_g1_ref, w_g2_ref, b_g2_ref,
                 attn_ref, res_ref, *, d_model, n_knn, tile_n):
    DM, K, T = d_model, n_knn, tile_n

    qx = qx_ref[0]                                        # (T, 2*DM) f32
    q = qx[:, :DM]
    xyzp_q = qx[:, DM:]

    g = g_ref[0]                                          # (T, K, 3*DM) bf16
    k_g = g[:, :, :DM].astype(f32)
    v_g = g[:, :, DM:2 * DM].astype(f32)
    xyzp_g = g[:, :, 2 * DM:].astype(f32)

    # fc_delta: (xyz_q - knn_xyz) @ W_d1 == xyz_q@W_d1 - knn_xyz@W_d1  (exact)
    h = jnp.maximum(xyzp_q[:, None, :] - xyzp_g + b_d1_ref[...], 0.0)   # (T,K,DM)
    pos = (jnp.dot(h.reshape(T * K, DM).astype(bf16), w_d2_ref[...],
                   preferred_element_type=f32)
           + b_d2_ref[...]).reshape(T, K, DM)

    # fc_gamma on (q - k + pos)
    g_in = (q[:, None, :] - k_g + pos).reshape(T * K, DM)
    hg = jnp.maximum(jnp.dot(g_in.astype(bf16), w_g1_ref[...],
                             preferred_element_type=f32) + b_g1_ref[...], 0.0)
    logits = (jnp.dot(hg.astype(bf16), w_g2_ref[...],
                      preferred_element_type=f32)
              + b_g2_ref[...]).reshape(T, K, DM)

    # softmax over the neighbour axis (dim=-2), scaled by 1/sqrt(d_model);
    # exact normalisation so the returned attn rows sum to 1.
    a = logits * (1.0 / math.sqrt(DM))
    a = a - jnp.max(a, axis=1, keepdims=True)
    e = jnp.exp(a)
    attn = e / jnp.sum(e, axis=1, keepdims=True)          # (T, K, DM) f32
    attn_ref[0] = attn.astype(attn_ref.dtype)             # bf16 writeback

    # einsum('mnf,mnf->mf', attn, v + pos)
    res_ref[0] = jnp.sum(attn * (v_g + pos), axis=1)      # (T, DM) f32


# --------------------------------------------------------------------------
# Kernel 3: epilogue — ConvolutionBlock + fc2 + residual (one batch per step).
# --------------------------------------------------------------------------
def _conv_fc2_kernel(res_ref, feat_ref,
                     w_pw_ref, b_pw_ref, w_dw_ref, b_dw_ref,
                     w_fc2_ref, b_fc2_ref,
                     out_ref, pwpad_scr,
                     *, n_points, kernel_size, c_exp, pad_up):
    N, ks, C = n_points, kernel_size, c_exp
    pad = (ks - 1) // 2

    res = res_ref[0]                                      # (N, DM) f32
    # TODO(synk): ConvolutionBlock source was not provided; approximated as
    # pointwise expand -> depthwise Conv1d(kernel_size, padding=SAME) -> ReLU.
    pw = (jnp.dot(res.astype(bf16), w_pw_ref[...],
                  preferred_element_type=f32) + b_pw_ref[...])      # (N, C)

    # 8-aligned zero-padded conv input in VMEM scratch.
    zpad = jnp.zeros((pad_up, C), f32)
    pwpad_scr[0:pad_up, :] = zpad
    pwpad_scr[pad_up + N:, :] = zpad
    pwpad_scr[pad_up:pad_up + N, :] = pw

    w_dw = w_dw_ref[...]                                  # (ks, C)
    base = pad_up - pad
    acc = jnp.zeros((N, C), f32)
    for tap in range(ks):                                 # static unroll
        acc = acc + (pwpad_scr[base + tap:base + tap + N, :]
                     * w_dw[tap:tap + 1, :])
    conv_out = jnp.maximum(acc + b_dw_ref[...], 0.0)      # (N, C)

    out = (jnp.dot(conv_out.astype(bf16), w_fc2_ref[...],
                   preferred_element_type=f32)
           + b_fc2_ref[...] + feat_ref[0])                # residual
    out_ref[0] = out.astype(out_ref.dtype)


# --------------------------------------------------------------------------
# Wrapper
# --------------------------------------------------------------------------
def transformer_block(xyz, features, params, *, k, kernel_size, tile_n=128):
    B, N, _ = xyz.shape
    d_points = features.shape[-1]
    DM = params["w_q"].shape[0]
    C = params["w_pw"].shape[1]                 # d_model * expansion
    ks = kernel_size

    # kNN indices (plain-JAX glue: full argsort has no Pallas equivalent).
    dif = xyz[:, :, None, :] - xyz[:, None, :, :]
    dists = jnp.sum(dif * dif, axis=-1)
    knn_idx = jnp.argsort(dists, axis=-1)[:, :, :k].astype(jnp.int32)  # (B,N,k)

    # Lane-pad d_points so fc2 / residual / output stores are full-width.
    P = _round_up(max(d_points, 1), 128)
    feat_pad = jnp.pad(features.astype(f32), ((0, 0), (0, 0), (0, P - d_points)))

    # Fold fc1 into the fused q/k/v projection (exact: q/k/v are bias-free).
    w_qkv = jnp.concatenate([params["w_q"], params["w_k"], params["w_v"]],
                            axis=1)                                    # (DM, 3DM)
    w_fc1_pad = jnp.pad(params["w_fc1"].astype(f32),
                        ((0, P - d_points), (0, 0)))
    w_qkv_full = (w_fc1_pad @ w_qkv).astype(f32)                       # (P, 3DM)
    b_qkv_full = (params["b_fc1"] @ w_qkv).astype(f32)                 # (1, 3DM)

    w_fc2_pad = jnp.pad(params["w_fc2"].astype(f32), ((0, 0), (0, P - d_points)))
    b_fc2_pad = jnp.pad(params["b_fc2"].astype(f32), ((0, 0), (0, P - d_points)))

    T = _pick_tile(N, tile_n)
    num_tiles = N // T

    # ---------------- Pallas call 1: per-point projections -------------------
    qx, kvx = pl.pallas_call(
        partial(_proj_kernel, d_model=DM),
        grid=(B, num_tiles),
        in_specs=[
            pl.BlockSpec((1, T, 3), lambda b, t: (b, t, 0)),
            pl.BlockSpec((1, T, P), lambda b, t: (b, t, 0)),
            pl.BlockSpec((P, 3 * DM), lambda b, t: (0, 0)),
            pl.BlockSpec((1, 3 * DM), lambda b, t: (0, 0)),
            pl.BlockSpec((3, DM), lambda b, t: (0, 0)),
        ],
        out_specs=(
            pl.BlockSpec((1, T, 2 * DM), lambda b, t: (b, t, 0)),
            pl.BlockSpec((1, T, 3 * DM), lambda b, t: (b, t, 0)),
        ),
        out_shape=(jax.ShapeDtypeStruct((B, N, 2 * DM), f32),
                   jax.ShapeDtypeStruct((B, N, 3 * DM), f32)),
        compiler_params=pltpu.CompilerParams(
            dimension_semantics=("parallel", "parallel")),
    )(xyz.astype(f32), feat_pad, w_qkv_full, b_qkv_full,
      params["w_d1"].astype(f32))

    # ---- plain-JAX glue: real neighbour gather (bf16 source, K*N*3DM bytes) --
    gsrc = kvx.astype(bf16)                                            # (B,N,3DM)
    g = jax.vmap(lambda src, idx: src[idx])(gsrc, knn_idx)             # (B,N,K,3DM)

    # ---------------- Pallas call 2: per-tile attention ----------------------
    weights2 = [
        params["b_d1"].astype(f32),
        params["w_d2"].astype(bf16), params["b_d2"].astype(f32),
        params["w_g1"].astype(bf16), params["b_g1"].astype(f32),
        params["w_g2"].astype(bf16), params["b_g2"].astype(f32),
    ]
    w2_bytes = sum(int(np.prod(w.shape)) * int(w.dtype.itemsize) for w in weights2)
    io_bytes = (B * N * 2 * DM * 4          # qx
                + B * N * k * 3 * DM * 2    # gathered neighbours (bf16)
                + B * N * k * DM * 2        # attn out (bf16)
                + B * N * DM * 4)           # res out
    cost = pl.CostEstimate(
        flops=int(3 * 2 * B * N * k * DM * DM + 12 * B * N * k * DM),
        transcendentals=int(B * N * k * DM),
        bytes_accessed=int(io_bytes + w2_bytes),
    )
    attn, res_attn = pl.pallas_call(
        partial(_attn_kernel, d_model=DM, n_knn=k, tile_n=T),
        grid=(B, num_tiles),
        in_specs=[
            pl.BlockSpec((1, T, 2 * DM), lambda b, t: (b, t, 0)),
            pl.BlockSpec((1, T, k, 3 * DM), lambda b, t: (b, t, 0, 0)),
        ] + [pl.BlockSpec(w.shape, lambda b, t: (0, 0)) for w in weights2],
        out_specs=(
            pl.BlockSpec((1, T, k, DM), lambda b, t: (b, t, 0, 0)),
            pl.BlockSpec((1, T, DM), lambda b, t: (b, t, 0)),
        ),
        out_shape=(jax.ShapeDtypeStruct((B, N, k, DM), bf16),
                   jax.ShapeDtypeStruct((B, N, DM), f32)),
        compiler_params=pltpu.CompilerParams(
            dimension_semantics=("parallel", "parallel"),
            vmem_limit_bytes=48 * 1024 * 1024),
        cost_estimate=cost,
    )(qx, g, *weights2)

    # ---------------- Pallas call 3: conv block + fc2 + residual -------------
    pad = (ks - 1) // 2
    pad_up = _round_up(max(pad, 1), 8)
    res_pad = pl.pallas_call(
        partial(_conv_fc2_kernel, n_points=N, kernel_size=ks, c_exp=C,
                pad_up=pad_up),
        grid=(B,),
        in_specs=[
            pl.BlockSpec((1, N, DM), lambda b: (b, 0, 0)),
            pl.BlockSpec((1, N, P), lambda b: (b, 0, 0)),
            pl.BlockSpec((DM, C), lambda b: (0, 0)),
            pl.BlockSpec((1, C), lambda b: (0, 0)),
            pl.BlockSpec((ks, C), lambda b: (0, 0)),
            pl.BlockSpec((1, C), lambda b: (0, 0)),
            pl.BlockSpec((C, P), lambda b: (0, 0)),
            pl.BlockSpec((1, P), lambda b: (0, 0)),
        ],
        out_specs=pl.BlockSpec((1, N, P), lambda b: (b, 0, 0)),
        out_shape=jax.ShapeDtypeStruct((B, N, P), f32),
        scratch_shapes=[pltpu.VMEM((N + 2 * pad_up, C), f32)],
        compiler_params=pltpu.CompilerParams(
            dimension_semantics=("parallel",),
            vmem_limit_bytes=48 * 1024 * 1024),
    )(res_attn, feat_pad,
      params["w_pw"].astype(bf16), params["b_pw"].astype(f32),
      params["w_dw"].astype(f32), params["b_dw"].astype(f32),
      w_fc2_pad.astype(bf16), b_fc2_pad)

    res = res_pad[..., :d_points]
    return res, attn          # attn returned in bf16 (halves HBM writeback)


# --------------------------------------------------------------------------
# Parameter init + pure-JAX reference (mirrors the PyTorch forward)
# --------------------------------------------------------------------------
def init_params(key, d_points, d_model, kernel_size, expansion):
    shapes = {
        "w_fc1": (d_points, d_model), "b_fc1": (1, d_model),
        "w_q": (d_model, d_model), "w_k": (d_model, d_model), "w_v": (d_model, d_model),
        "w_d1": (3, d_model), "b_d1": (1, d_model),
        "w_d2": (d_model, d_model), "b_d2": (1, d_model),
        "w_g1": (d_model, d_model), "b_g1": (1, d_model),
        "w_g2": (d_model, d_model), "b_g2": (1, d_model),
        "w_pw": (d_model, d_model * expansion), "b_pw": (1, d_model * expansion),
        "w_dw": (kernel_size, d_model * expansion), "b_dw": (1, d_model * expansion),
        "w_fc2": (d_model * expansion, d_points), "b_fc2": (1, d_points),
    }
    keys = jax.random.split(key, len(WEIGHT_ORDER))
    params = {}
    for name, kk in zip(WEIGHT_ORDER, keys):
        shape = shapes[name]
        fan_in = shape[0] if name.startswith("w") else 4
        scale = 1.0 / math.sqrt(max(fan_in, 1))
        params[name] = jax.random.normal(kk, shape, jnp.float32) * scale
    return params


def reference_forward(xyz, features, params, *, k, kernel_size):
    d_model = params["w_q"].shape[0]
    N = xyz.shape[1]
    dif = xyz[:, :, None, :] - xyz[:, None, :, :]
    dists = jnp.sum(dif * dif, axis=-1)
    knn_idx = jnp.argsort(dists, axis=-1)[:, :, :k]
    gather = jax.vmap(lambda pts, idx: pts[idx])
    knn_xyz = gather(xyz, knn_idx)
    x = features @ params["w_fc1"] + params["b_fc1"]
    q = x @ params["w_q"]
    kk = gather(x @ params["w_k"], knn_idx)
    vv = gather(x @ params["w_v"], knn_idx)
    delta = xyz[:, :, None, :] - knn_xyz
    pos = (jax.nn.relu(delta @ params["w_d1"] + params["b_d1"])
           @ params["w_d2"] + params["b_d2"])
    g = (jax.nn.relu((q[:, :, None, :] - kk + pos) @ params["w_g1"] + params["b_g1"])
         @ params["w_g2"] + params["b_g2"])
    attn = jax.nn.softmax(g / math.sqrt(d_model), axis=-2)
    res = jnp.einsum("bmnf,bmnf->bmf", attn, vv + pos)
    pw = res @ params["w_pw"] + params["b_pw"]
    pad = (kernel_size - 1) // 2
    padded = jnp.pad(pw, ((0, 0), (pad, pad), (0, 0)))
    acc = sum(padded[:, t:t + N, :] * params["w_dw"][t][None, None, :]
              for t in range(kernel_size))
    conv_out = jax.nn.relu(acc + params["b_dw"])
    out = conv_out @ params["w_fc2"] + params["b_fc2"] + features
    return out, attn


if __name__ == "__main__":
    B, N, d_points, d_model, K = 2, 16, 8, 32, 4
    kernel_size, expansion = 31, 2

    key = jax.random.PRNGKey(0)
    k_xyz, k_feat, k_par = jax.random.split(key, 3)
    xyz = jax.random.normal(k_xyz, (B, N, 3), jnp.float32)
    features = jax.random.normal(k_feat, (B, N, d_points), jnp.float32)
    params = init_params(k_par, d_points, d_model, kernel_size, expansion)

    res, attn = transformer_block(xyz, features, params, k=K,
                                  kernel_size=kernel_size, tile_n=8)
    jax.block_until_ready((res, attn))

    assert res.shape == (B, N, d_points)
    assert attn.shape == (B, N, K, d_model)

    res_r, attn_r = reference_forward(xyz, features, params, k=K,
                                      kernel_size=kernel_size)
    # bf16 MXU operands / bf16 attn writeback (f32 accumulation) -> loose tols.
    np.testing.assert_allclose(np.asarray(attn, dtype=np.float32),
                               np.asarray(attn_r), rtol=3e-2, atol=3e-2)
    np.testing.assert_allclose(np.asarray(res, dtype=np.float32),
                               np.asarray(res_r), rtol=5e-2, atol=5e-2)

    print("KERNEL_OK")
</pallas_src>

<mosaic_0001>
module attributes {stable_mosaic.version = 11 : i64} {
  func.func @_proj_kernel(%arg0: i32, %arg1: i32, %arg2: memref<1x8x3xf32, #tpu.memory_space<vmem>>, %arg3: memref<1x8x128xf32, #tpu.memory_space<vmem>>, %arg4: memref<128x96xf32, #tpu.memory_space<vmem>>, %arg5: memref<1x96xf32, #tpu.memory_space<vmem>>, %arg6: memref<3x32xf32, #tpu.memory_space<vmem>>, %arg7: memref<1x8x64xf32, #tpu.memory_space<vmem>>, %arg8: memref<1x8x96xf32, #tpu.memory_space<vmem>>) attributes {dimension_semantics = [#tpu.dimension_semantics<parallel>, #tpu.dimension_semantics<parallel>], iteration_bounds = array<i64: 2, 2>, scalar_prefetch = 0 : i64, scratch_operands = 0 : i64, tpu.core_type = #tpu.core_type<tc>, window_params = [{transform_indices = @transform_0, window_bounds = array<i64: 1, 8, 3>}, {transform_indices = @transform_1, window_bounds = array<i64: 1, 8, 128>}, {pipeline_mode = #tpu.pipeline_mode<synchronous>, transform_indices = @transform_2, window_bounds = array<i64: 128, 96>}, {pipeline_mode = #tpu.pipeline_mode<synchronous>, transform_indices = @transform_3, window_bounds = array<i64: 1, 96>}, {pipeline_mode = #tpu.pipeline_mode<synchronous>, transform_indices = @transform_4, window_bounds = array<i64: 3, 32>}, {transform_indices = @transform_5, window_bounds = array<i64: 1, 8, 64>}, {transform_indices = @transform_6, window_bounds = array<i64: 1, 8, 96>}]} {
    %c0 = arith.constant 0 : index
    %c0_0 = arith.constant 0 : index
    %c0_1 = arith.constant 0 : index
    %0 = vector.load %arg3[%c0, %c0_0, %c0_1] : memref<1x8x128xf32, #tpu.memory_space<vmem>>, vector<1x8x128xf32>
    %1 = vector.shape_cast %0 : vector<1x8x128xf32> to vector<8x128xf32>
    %c0_2 = arith.constant 0 : index
    %c0_3 = arith.constant 0 : index
    %c0_4 = arith.constant 0 : index
    %2 = vector.load %arg2[%c0_2, %c0_3, %c0_4] : memref<1x8x3xf32, #tpu.memory_space<vmem>>, vector<1x8x3xf32>
    %3 = vector.shape_cast %2 : vector<1x8x3xf32> to vector<8x3xf32>
    %c0_5 = arith.constant 0 : index
    %c0_6 = arith.constant 0 : index
    %4 = vector.load %arg4[%c0_5, %c0_6] : memref<128x96xf32, #tpu.memory_space<vmem>>, vector<128x96xf32>
    %cst = arith.constant dense<0.000000e+00> : vector<8x96xf32>
    %5 = tpu.matmul %1, %4, %cst {dimension_numbers = #tpu.dot_dimension_numbers<[1], [0], [0], [1], [0, 0, 1, 1], [], []>} : vector<8x128xf32>, vector<128x96xf32>, vector<8x96xf32> -> vector<8x96xf32>
    %c0_7 = arith.constant 0 : index
    %c0_8 = arith.constant 0 : index
    %6 = vector.load %arg5[%c0_7, %c0_8] : memref<1x96xf32, #tpu.memory_space<vmem>>, vector<1x96xf32>
    %7 = vector.broadcast %6 : vector<1x96xf32> to vector<8x96xf32>
    %8 = arith.addf %5, %7 : vector<8x96xf32>
    %c0_9 = arith.constant 0 : index
    %c0_10 = arith.constant 0 : index
    %9 = vector.load %arg6[%c0_9, %c0_10] : memref<3x32xf32, #tpu.memory_space<vmem>>, vector<3x32xf32>
    %10 = vector.extract_strided_slice %3 {offsets = [0, 0], sizes = [8, 1], strides = [1, 1]} : vector<8x3xf32> to vector<8x1xf32>
    %11 = vector.extract_strided_slice %9 {offsets = [0, 0], sizes = [1, 32], strides = [1, 1]} : vector<3x32xf32> to vector<1x32xf32>
    %12 = vector.broadcast %10 : vector<8x1xf32> to vector<8x32xf32>
    %13 = vector.broadcast %11 : vector<1x32xf32> to vector<8x32xf32>
    %14 = arith.mulf %12, %13 : vector<8x32xf32>
    %15 = vector.extract_strided_slice %3 {offsets = [0, 1], sizes = [8, 1], strides = [1, 1]} : vector<8x3xf32> to vector<8x1xf32>
    %16 = vector.extract_strided_slice %9 {offsets = [1, 0], sizes = [1, 32], strides = [1, 1]} : vector<3x32xf32> to vector<1x32xf32>
    %17 = vector.broadcast %15 : vector<8x1xf32> to vector<8x32xf32>
    %18 = vector.broadcast %16 : vector<1x32xf32> to vector<8x32xf32>
    %19 = arith.mulf %17, %18 : vector<8x32xf32>
    %20 = arith.addf %14, %19 : vector<8x32xf32>
    %21 = vector.extract_strided_slice %3 {offsets = [0, 2], sizes = [8, 1], strides = [1, 1]} : vector<8x3xf32> to vector<8x1xf32>
    %22 = vector.extract_strided_slice %9 {offsets = [2, 0], sizes = [1, 32], strides = [1, 1]} : vector<3x32xf32> to vector<1x32xf32>
    %23 = vector.broadcast %21 : vector<8x1xf32> to vector<8x32xf32>
    %24 = vector.broadcast %22 : vector<1x32xf32> to vector<8x32xf32>
    %25 = arith.mulf %23, %24 : vector<8x32xf32>
    %26 = arith.addf %20, %25 : vector<8x32xf32>
    %27 = vector.extract_strided_slice %8 {offsets = [0, 0], sizes = [8, 32], strides = [1, 1]} : vector<8x96xf32> to vector<8x32xf32>
    %c0_11 = arith.constant 0 : index
    %c0_12 = arith.constant 0 : index
    %c0_13 = arith.constant 0 : index
    %28 = vector.load %arg7[%c0_11, %c0_12, %c0_13] : memref<1x8x64xf32, #tpu.memory_space<vmem>>, vector<1x8x32xf32>
    %29 = vector.shape_cast %28 : vector<1x8x32xf32> to vector<8x32xf32>
    %30 = vector.shape_cast %27 : vector<8x32xf32> to vector<1x8x32xf32>
    tpu.vector_store %arg7[%c0_11, %c0_12, %c0_13], %30 {strides = array<i32>} : memref<1x8x64xf32, #tpu.memory_space<vmem>>, vector<1x8x32xf32>,
    %c0_14 = arith.constant 0 : index
    %c0_15 = arith.constant 0 : index
    %c32 = arith.constant 32 : index
    %31 = vector.load %arg7[%c0_14, %c0_15, %c32] : memref<1x8x64xf32, #tpu.memory_space<vmem>>, vector<1x8x32xf32>
    %32 = vector.shape_cast %31 : vector<1x8x32xf32> to vector<8x32xf32>
    %33 = vector.shape_cast %26 : vector<8x32xf32> to vector<1x8x32xf32>
    tpu.vector_store %arg7[%c0_14, %c0_15, %c32], %33 {strides = array<i32>} : memref<1x8x64xf32, #tpu.memory_space<vmem>>, vector<1x8x32xf32>,
    %34 = vector.extract_strided_slice %8 {offsets = [0, 32], sizes = [8, 64], strides = [1, 1]} : vector<8x96xf32> to vector<8x64xf32>
    %c0_16 = arith.constant 0 : index
    %c0_17 = arith.constant 0 : index
    %c0_18 = arith.constant 0 : index
    %35 = vector.load %arg8[%c0_16, %c0_17, %c0_18] : memref<1x8x96xf32, #tpu.memory_space<vmem>>, vector<1x8x64xf32>
    %36 = vector.shape_cast %35 : vector<1x8x64xf32> to vector<8x64xf32>
    %37 = vector.shape_cast %34 : vector<8x64xf32> to vector<1x8x64xf32>
    tpu.vector_store %arg8[%c0_16, %c0_17, %c0_18], %37 {strides = array<i32>} : memref<1x8x96xf32, #tpu.memory_space<vmem>>, vector<1x8x64xf32>,
    %c0_19 = arith.constant 0 : index
    %c0_20 = arith.constant 0 : index
    %c64 = arith.constant 64 : index
    %38 = vector.load %arg8[%c0_19, %c0_20, %c64] : memref<1x8x96xf32, #tpu.memory_space<vmem>>, vector<1x8x32xf32>
    %39 = vector.shape_cast %38 : vector<1x8x32xf32> to vector<8x32xf32>
    %40 = vector.shape_cast %26 : vector<8x32xf32> to vector<1x8x32xf32>
    tpu.vector_store %arg8[%c0_19, %c0_20, %c64], %40 {strides = array<i32>} : memref<1x8x96xf32, #tpu.memory_space<vmem>>, vector<1x8x32xf32>,
    return
  }
  func.func @transform_0(%arg0: i32, %arg1: i32) -> (i32, i32, i32) {
    %c0_i32 = arith.constant 0 : i32
    %c0_i32_0 = arith.constant 0 : i32
    return %arg0, %arg1, %c0_i32 : i32, i32, i32
  }
  func.func @transform_1(%arg0: i32, %arg1: i32) -> (i32, i32, i32) {
    %c0_i32 = arith.constant 0 : i32
    %c0_i32_0 = arith.constant 0 : i32
    return %arg0, %arg1, %c0_i32 : i32, i32, i32
  }
  func.func @transform_2(%arg0: i32, %arg1: i32) -> (i32, i32) {
    %c0_i32 = arith.constant 0 : i32
    %c0_i32_0 = arith.constant 0 : i32
    %c0_i32_1 = arith.constant 0 : i32
    return %c0_i32, %c0_i32_0 : i32, i32
  }
  func.func @transform_3(%arg0: i32, %arg1: i32) -> (i32, i32) {
    %c0_i32 = arith.constant 0 : i32
    %c0_i32_0 = arith.constant 0 : i32
    %c0_i32_1 = arith.constant 0 : i32
    return %c0_i32, %c0_i32_0 : i32, i32
  }
  func.func @transform_4(%arg0: i32, %arg1: i32) -> (i32, i32) {
    %c0_i32 = arith.constant 0 : i32
    %c0_i32_0 = arith.constant 0 : i32
    %c0_i32_1 = arith.constant 0 : i32
    return %c0_i32, %c0_i32_0 : i32, i32
  }
  func.func @transform_5(%arg0: i32, %arg1: i32) -> (i32, i32, i32) {
    %c0_i32 = arith.constant 0 : i32
    %c0_i32_0 = arith.constant 0 : i32
    return %arg0, %arg1, %c0_i32 : i32, i32, i32
  }
  func.func @transform_6(%arg0: i32, %arg1: i32) -> (i32, i32, i32) {
    %c0_i32 = arith.constant 0 : i32
    %c0_i32_0 = arith.constant 0 : i32
    return %arg0, %arg1, %c0_i32 : i32, i32, i32
  }
}

</mosaic_0001>

<bundles_post_ra>
// kernel: tpu_custom_call.1
= control target key start
LH: loop header
LB: loop body
LE: loop exit
PB: predicated region body
PF: predicated region fallthrough
CT: control target
= control target key end

     0   :  { %s1229_s0 = inlined_call_operand.vmem [shape: f32[2,16,3], index: 0, kind: input, shape index: {}]   ;;  %s1230_s1 = inlined_call_operand.vmem [shape: f32[2,16,128], index: 1, kind: input, shape index: {}]   ;;  %s1231_s2 = inlined_call_operand.vmem [shape: f32[128,96], index: 2, kind: input, shape index: {}]   ;;  %s1232_s3 = inlined_call_operand.vmem [shape: f32[1,96], index: 3, kind: input, shape index: {}]   ;;  %s1233_s4 = inlined_call_operand.vmem [shape: f32[3,32], index: 4, kind: input, shape index: {}]   ;;  %s1234_s5 = inlined_call_operand.hbm [shape: f32[2,16,64], index: 5, kind: output, shape index: {0}]   ;;  %s1235_s6 = inlined_call_operand.hbm [shape: f32[2,16,96], index: 6, kind: output, shape index: {1}]  }
   0x1   :  { %1236 = sst [smem:[#allocation8_spill]] %s1229_s0 }
   0x2   :  { %1237 = sst [smem:[#allocation9_spill]] %s1230_s1 }
   0x3   :  { %1238 = sst [smem:[#allocation10_spill]] %s1231_s2 }
   0x4   :  { %12 = vsyncpa [#allocation3], 0 }
   0x5   :  { %14 = vsyncpa [#allocation3 + $0x1], 0 }
   0x6   :  { %15 = vsyncpa [#allocation5], 0 }
   0x7   :  { %17 = vsyncpa [#allocation5 + $0x1], 0  ;;  %s989_s21 = smov 0   ;;  %s991_s22 = smov 0  }
   0x8   :  { %s993_s23 = smov 0   ;;  %s995_s24 = smov 0  }
   0x9   :  { %s997_s25 = smov 0   ;;  %s999_s26 = smov 0  }
   0xa   :  { %s1001_s27 = smov 0   ;;  %s1003_s28 = smov 0  }
   0xb LB: > { %s630_s29 = sadd.s32 4294967295, %s941_s28   ;;  %s631_s30 = sadd.s32 4294967294, %s941_s28   ;;  %s941_s28 = sphi %s1003_s28, %s23_s28   ;;  %s937_s27 = sphi %s1001_s27, %s1250_s27   ;;  %s933_s26 = sphi %s999_s26, %s1249_s26   ;;  %s929_s25 = sphi %s997_s25, %s1248_s25   ;;  %s925_s24 = sphi %s995_s24, %s1247_s24   ;;  %s921_s23 = sphi %s993_s23, %s1246_s23   ;;  %s917_s22 = sphi %s991_s22, %s1245_s22   ;;  %s913_s21 = sphi %s989_s21, %s1244_s21  }
   0xc   : > { %s32_s7 = sadd.s32 1, %s933_s26  ;;  %s35_s8 = sadd.s32 1, %s937_s27 }
   0xd   : > { %p33_p0 = scmp.ge.s32.totalorder %s32_s7, 2  ;;  %p173_p1 = scmp.ne.s32.totalorder %s921_s23, %s917_s22 }
   0xe   : > { %p174_p2 = scmp.eq.s32.totalorder %s630_s29, 3  ;;  %p179_p5 = scmp.ne.s32.totalorder %s917_s22, %s913_s21 }
   0xf   : > { %s1252_s7 = smov (%p33_p0, %s32_s7), 0  ;;  %s1254_s8 = smov (!%p33_p0, %s35_s8), %s937_s27 }
  0x10   : > { %s159_s9 = ssub.s32 %s933_s26, %s1252_s7  ;;  %p1040_p3 = por %p174_p2, %p173_p1 }
  0x11   : > { %p37_p4 = scmp.ge.s32.totalorder %s1254_s8, 2  ;;  %p180_p6 = scmp.eq.s32.totalorder %s631_s30, 3 }
  0x12   : > { %p634_p7 = scmp.ge.s32.totalorder %s941_s28, 1  ;;  %p257_p9 = scmp.lt.s32.totalorder %s941_s28, 5 }
  0x13   : > { %s1256_s8 = smov (%p37_p4, %s1254_s8), 0  ;;  %p1049_p8 = por %p180_p6, %p179_p5 }
  0x14   : > { %s158_s12 = ssub.s32 %s937_s27, %s1256_s8  ;;  %s163_s13 = sadd.s32 1, %s921_s23 }
  0x15   : > { %s160_s14 = sor.u32 %s159_s9, %s158_s12  ;;  %p258_p10 = pnand %p634_p7, %p257_p9 }
  0x16   : > { %p161_p11 = scmp.eq.s32.totalorder %s160_s14, 0  ;;  %s1241_s2 = sld [smem:[#allocation10_spill]] (!%p258_p10)  ;;  %v943_v3 = vmov (!%p258_p10), 0.0|0.0   ;;  %vm944_vm0 = vmmov (!%p258_p10), 0   ;;  %v945_v6 = vmov (!%p258_p10), 0.0   ;;  %v946_v7 = vmov (!%p258_p10), 0  }
  0x17   : > { %261 = sbr.rel (%p258_p10) target bundleno = 429 (0x1ad), region = 40  ;;  %702 = vmatprep.subr.bf16.mxu0 (!%p258_p10), %v943_v3  ;;  %699 = vmatprep.mubr.msk.f32.mxu0 (!%p258_p10), %vm944_vm0, %v945_v6  ;;  %p303_p12 = scmp.lt.s32.totalorder (!%p258_p10), %s929_s25, 1  ;;  %v947_v9 = vmov (!%p258_p10), 2   ;;  %v948_v19 = vmov (!%p258_p10), 1   ;;  %v420_v31 = vlaneseq (!%p258_p10)  ;;  %v414_v34 = vld [vmem:[%s1233_s4] sm:$0x7] (!%p258_p10) }
  0x18   : > { %s1058_s15 = scalar_select %p161_p11, %s921_s23, %s163_s13  }
  0x19   : > { %p305_p13 = scmp.lt.s32.totalorder (!%p258_p10), %s925_s24, 1  ;;  %811 = vset.pattern.permute.xlu0 (!%p258_p10), %v946_v7  ;;  %813 = vset.pattern.permute.xlu1 (!%p258_p10), %v947_v9  ;;  %s1242_s0 = sld [smem:[#allocation8_spill]] (!%p258_p10)  ;;  %v421_v32 = vshrl.u32 (!%p258_p10), %v420_v31, 7  ;;  %v641_v48 = vld [vmem:[%s1232_s3] ss:$0 sm:$0xff] (!%p258_p10)  ;;  %vm445_vm1 = vcmask (!%p258_p10), 261120  }
  0x1a   : > { %s1243_s1 = sld [smem:[#allocation9_spill]] (!%p258_p10)  ;;  %s950_s17 = smov (!%p258_p10), 96   ;;  %vm457_vm2 = vcmask (!%p258_p10), 523264   ;;  %vm462_vm3 = vcmask (!%p258_p10), 785920   ;;  %vm451_vm4 = vcmask (!%p258_p10), 523520  }
  0x1b   : > { %v422_v33 = vsub.s32 (!%p258_p10), 0, %v421_v32  ;;  %v431_v35 = vsub.s32 (!%p258_p10), 1, %v421_v32  ;;  %v441_v36 = vsub.s32 (!%p258_p10), 2, %v421_v32 }
  0x1c   : > { %v321_v0 = vld [vmem:[%s1241_s2] sm:$0xff] (!%p258_p10)  ;;  %v322_v1 = vld [vmem:[%s1241_s2 + $0x8] sm:$0xff] (!%p258_p10)  ;;  %v323_v2 = vld [vmem:[%s1241_s2 + $0x10] sm:$0xff] (!%p258_p10) }
  0x1d   : > { %v703_v4 = vpack.c.bf16 (!%p258_p10), %v322_v1, %v321_v0  ;;  %v324_v5 = vld [vmem:[%s1241_s2 + $0x18] sm:$0xff] (!%p258_p10)  ;;  %v325_v10 = vld [vmem:[%s1241_s2 + $0x20] sm:$0xff] (!%p258_p10)  ;;  %v326_v11 = vld [vmem:[%s1241_s2 + $0x28] sm:$0xff] (!%p258_p10)  ;;  %v423_v37 = vrot.slane (!%p258_p10), %v414_v34, %v422_v33  ;;  %v432_v39 = vrot.slane (!%p258_p10), %v414_v34, %v431_v35  ;;  %v442_v40 = vrot.slane (!%p258_p10), %v414_v34, %v441_v36 }
  0x1e   : > { %v706_v8 = vpack.c.bf16 %v324_v5, %v323_v2  ;;  %s304_s12 = scalar_select %p303_p12, %s929_s25, 1  ;;  %v709_v12 = vpack.c.bf16 %v326_v11, %v325_v10  ;;  %v327_v13 = vld [vmem:[%s1241_s2 + $0x30] sm:$0xff]  ;;  %v328_v14 = vld [vmem:[%s1241_s2 + $0x38] sm:$0xff]  ;;  %v329_v17 = vld [vmem:[%s1241_s2 + $0x40] sm:$0xff] }
  0x1f   : > { %704 = vmatpush3.bf16.msra.mxu0 %v703_v4  ;;  %s306_s18 = scalar_select %p305_p13, %s925_s24, 1  ;;  %v712_v16 = vpack.c.bf16 %v328_v14, %v327_v13  ;;  %v330_v18 = vld [vmem:[%s1241_s2 + $0x48] sm:$0xff]  ;;  %v331_v21 = vld [vmem:[%s1241_s2 + $0x50] sm:$0xff]  ;;  %v332_v22 = vld [vmem:[%s1241_s2 + $0x58] sm:$0xff] }
  0x20   : > { %705 = vmatprep.subr.bf16.mxu0 %v943_v3  ;;  %s637_s19 = sshll.u32 %s304_s12, 1  ;;  %v715_v20 = vpack.c.bf16 %v330_v18, %v329_v17  ;;  %v718_v23 = vpack.c.bf16 %v332_v22, %v331_v21  ;;  %v333_v24 = vld [vmem:[%s1241_s2 + $0x60] sm:$0xff]  ;;  %v334_v25 = vld [vmem:[%s1241_s2 + $0x68] sm:$0xff]  ;;  %v335_v27 = vld [vmem:[%s1241_s2 + $0x70] sm:$0xff] }
  0x21   : > { %s1082_s20 = sadd.s32 %s637_s19, %s306_s18  ;;  %v721_v26 = vpack.c.bf16 %v334_v25, %v333_v24  ;;  %v336_v28 = vld [vmem:[%s1241_s2 + $0x78] sm:$0xff] }
  0x22   : > { %s638_s29 = sshll.u32 %s1082_s20, 3  ;;  %v724_v29 = vpack.c.bf16 %v336_v28, %v335_v27  ;;  %s949_s20 = smov 64  }
  0x23   : > { %707 = vmatpush3.bf16.msra.mxu0 %v706_v8  ;;  %s310_s12 = scalar_lea.vmem %s1242_s0, %s638_s29  ;;  %s318_s18 = scalar_lea.vmem %s1243_s1, %s638_s29 }
  0x24   : > { %708 = vmatprep.subr.bf16.mxu0 %v943_v3  ;;  %v320_v15 = vld [vmem:[%s310_s12] sm:$0xff]  ;;  %s1129_s29 = sand.u32 1, %s917_s22   ;;  %s951_s12 = smov 32  }
  0x25   : > { %417 = vperm.xlu0 %811, %v320_v15   ;;  %436 = vperm.xlu1 %813, %v320_v15   ;;  %v319_v30 = vld [vmem:[%s318_s18] sm:$0xff]  ;;  %s635_s9 = sshll.u32 %s1129_s29, 3  ;;  %s644_s18 = sshll.u32 %s929_s25, 1 }
  0x26   : > { %s1135_s16 = scalar_lea.vmem [#allocation2], %s635_s9  ;;  %s481_s19 = sadd.s32 %s925_s24, %s644_s18 }
  0x27   : > { %710 = vmatpush3.bf16.msra.mxu0 %v709_v12  ;;  %s645_s30 = sshll.u32 %s481_s19, 7  ;;  %s485_s14 = sshll.u32 %s1135_s16, 4  ;;  %s1153_s14 = int_to_ptr.vmem [resolvable:$true] %s485_s14 }
  0x28   : > { %711 = vmatprep.subr.bf16.mxu0 %v943_v3  ;;  %s1144_s2 = scalar_lea.hbm %s1235_s6, %s645_s30  ;;  %s952_s1 = smov [#allocation4]  }
  0x29   : > { %812 = vset.pattern.permute.xlu0 %v948_v19 }
  0x2a   : > { %426 = vperm.xlu0 %812, %v320_v15  }
  0x2b   : > { %713 = vmatpush3.bf16.msra.mxu0 %v712_v16 }
  0x2c   : > { %714 = vmatprep.subr.bf16.mxu0 %v943_v3 }
  0x2e   : > { %814 = vset.pattern.permute.xlu0 %v947_v9 }
  0x2f   : > { %716 = vmatpush3.bf16.msra.mxu0 %v715_v20 }
  0x30   : > { %717 = vmatprep.subr.bf16.mxu0 %v943_v3 }
  0x33   : > { %719 = vmatpush3.bf16.msra.mxu0 %v718_v23 }
  0x34   : > { %720 = vmatprep.subr.bf16.mxu0 %v943_v3 }
  0x37   : > { %722 = vmatpush3.bf16.msra.mxu0 %v721_v26 }
  0x38   : > { %723 = vmatprep.subr.bf16.mxu0 %v943_v3 }
  0x3b   : > { %725 = vmatpush3.bf16.msra.mxu0 %v724_v29 }
  0x3e   : > { %700 = vmatmul.mubr.f32.vlgmr.msra.gmra.mrb[0].mxu0 %v319_v30 }
  0xa4   : > { %v418_v38 = vpop.permute.xlu0 %417  ;;  %v437_v41 = vpop.permute.xlu1 %436 }
  0xa5   : > { %v424_v42 = vmul.f32 %v423_v37, %v418_v38  ;;  %v443_v45 = vmul.f32 %v442_v40, %v437_v41 }
  0xa9   : > { %v427_v43 = vpop.permute.xlu0 %426 }
  0xaa   : > { %v433_v44 = vmul.f32 %v432_v39, %v427_v43 }
  0xac   : > { %v434_v46 = vadd.f32 %v433_v44, %v424_v42 }
  0xae   : > { %v444_v47 = vadd.f32 %v443_v45, %v434_v46 }
  0xb0   : > { %459 = vrot.lane.b32.xlu0 %v444_v47, %s949_s20  ;;  %s302_s20 = scalar_lea.vmem [#allocation4], %s635_s9  ;;  %s1151_s9 = scalar_lea.hbm %s1234_s5, %s645_s30 }
  0xb1   : > { %s500_s13 = sshll.u32 %s302_s20, 4  ;;  %s1146_s13 = int_to_ptr.vmem [resolvable:$true] %s500_s13 }
  0xb2   : > { %s815_s0 = scalar_lea.vmem %s1146_s13, 128 }
  0xb3   : > { %p816_p0 = scmp.ne.s32.totalorder %s1146_s13, %s815_s0 }
  0xb5   : > { %p817_p1 = pnand %p816_p0, %p1040_p3 }
  0xb7   : > { %p818_p2 = pneg %p817_p1 }
 0x111   : > { %v410_v49 = vpop.f32.mrb[0].mxu0 }
 0x112   : > { %v411_v50 = vadd.f32 %v641_v48, %v410_v49  ;;  %v701_v51 = vpop.f32.mrb[1].mxu0 }
 0x114   : > { %446 = vst.msk [vmem:[%s1135_s16] sm:$0xff] %vm445_vm1, %v411_v50  ;;  %454 = vrot.lane.b32.xlu1 %v411_v50, %s950_s17  ;;  %s470_s17 = scalar_lea.sflag [#allocation5], %s1129_s29 }
 0x118   : > { %448 = vrot.lane.b32.xlu1 %v444_v47, %s951_s12  ;;  %s819_s12 = sshll.u32 %s952_s1, 4  ;;  %s820_s12 = int_to_ptr.vmem [resolvable:$false] %s819_s12 }
 0x119   : > { %s821_s18 = scalar_lea.vmem %s820_s12, 256  ;;  %p822_p4 = scmp.lt.s32.totalorder %s1146_s13, %s820_s12 }
 0x11a   : > { %p823_p5 = scmp.lt.s32.totalorder %s821_s18, %s815_s0 }
 0x11c   : > { %p824_p6 = por %p823_p5, %p822_p4 }
 0x11e   : > { %p825_p7 = pnand %p824_p6, %p818_p2 }
 0x122   : > { %v460_v53 = vpop.permute.xlu0 %459 }
 0x186   : > { %v455_v52 = vpop.permute.xlu1 %454 }
 0x187   : > { %458 = vst.msk [vmem:[%s302_s20] sm:$0xff] %vm457_vm2, %v455_v52 }
 0x188   : > { %463 = vst.msk [vmem:[%s302_s20] sm:$0xff] %vm462_vm3, %v460_v53 }
 0x189   : > { %828 = shalt.err (!%p825_p7)
}
 0x18a   : > { %s829_s19 = scalar_lea.hbm %s1144_s2, 128  ;;  %s833_s24 = scalar_lea.hbm %s1235_s6, 512 }
 0x18b   : > { %p830_p9 = scmp.ne.s32.totalorder %s1144_s2, %s829_s19  ;;  %p834_p12 = scmp.lt.u32.totalorder %s1144_s2, %s1235_s6 }
 0x18c   : > { %p835_p13 = scmp.lt.u32.totalorder %s833_s24, %s829_s19  ;;  %p837_p1 = scmp.lt.u32.totalorder %s829_s19, %s1144_s2 }
 0x18d   : > { %p831_p10 = pnand %p830_p9, %p1040_p3 }
 0x18e   : > { %p836_p0 = por %p835_p13, %p834_p12 }
 0x18f   : > { %p832_p11 = pneg %p831_p10 }
 0x190   : > { %p838_p2 = por %p837_p1, %p836_p0 }
 0x192   : > { %p839_p4 = pnand %p838_p2, %p832_p11 }
 0x194   : > { %842 = shalt.err (!%p839_p4)
}
 0x195   : > { %727 = dma.vmem_to_hbm [thread:$0]  (%p1040_p3), %s1146_s13, 128, %s1144_s2, %s470_s17   ;;  %v449_v54 = vpop.permute.xlu1 %448 }
 0x196   : > { %452 = vst.msk [vmem:[%s1135_s16] sm:$0xff] %vm451_vm4, %v449_v54  ;;  %s465_s0 = scalar_lea.sflag [#allocation3], %s1129_s29  ;;  %s843_s12 = scalar_lea.vmem %s1153_s14, 128 }
 0x197   : > { %p844_p5 = scmp.ne.s32.totalorder %s1153_s14, %s843_s12  ;;  %s953_s18 = smov [#allocation2]  }
 0x198   : > { %s847_s19 = sshll.u32 %s953_s18, 4  ;;  %s848_s19 = int_to_ptr.vmem [resolvable:$false] %s847_s19 }
 0x199   : > { %p845_p6 = pnand %p844_p5, %p1040_p3  ;;  %s849_s30 = scalar_lea.vmem %s848_s19, 256 }
 0x19a   : > { %p850_p9 = scmp.lt.s32.totalorder %s1153_s14, %s848_s19  ;;  %p851_p10 = scmp.lt.s32.totalorder %s849_s30, %s843_s12 }
 0x19b   : > { %p846_p7 = pneg %p845_p6 }
 0x19c   : > { %p852_p11 = por %p851_p10, %p850_p9 }
 0x19e   : > { %p853_p12 = pnand %p852_p11, %p846_p7 }
 0x1a0   : > { %856 = shalt.err (!%p853_p12)
}
 0x1a1   : > { %s857_s2 = scalar_lea.hbm %s1151_s9, 128  ;;  %s861_s13 = scalar_lea.hbm %s1234_s5, 512 }
 0x1a2   : > { %p858_p13 = scmp.ne.s32.totalorder %s1151_s9, %s857_s2  ;;  %p862_p2 = scmp.lt.u32.totalorder %s1151_s9, %s1234_s5 }
 0x1a3   : > { %p863_p4 = scmp.lt.u32.totalorder %s861_s13, %s857_s2  ;;  %p865_p6 = scmp.lt.u32.totalorder %s857_s2, %s1151_s9 }
 0x1a4   : > { %p859_p0 = pnand %p858_p13, %p1040_p3 }
 0x1a5   : > { %p864_p5 = por %p863_p4, %p862_p2 }
 0x1a6   : > { %p860_p1 = pneg %p859_p0 }
 0x1a7   : > { %p866_p7 = por %p865_p6, %p864_p5 }
 0x1a9   : > { %p867_p9 = pnand %p866_p7, %p860_p1 }
 0x1ab   : > { %870 = shalt.err (!%p867_p9)
}
 0x1ac   : > { %726 = dma.vmem_to_hbm [thread:$0]  (%p1040_p3), %s1153_s14, 128, %s1151_s9, %s465_s0  }
 0x1ad PF: > { %p737_p10 = scmp.ge.s32.totalorder %s941_s28, 2  ;;  %s512_s24 = sand.u32 1, %s913_s21  }
 0x1ae   : > { %s513_s25 = scalar_lea.sflag [#allocation3], %s512_s24 }
 0x1af   : > { %p731_p11 = pnand %p737_p10, %p1049_p8 }
 0x1b1   : > { %904 = dma.done.wait (!%p731_p11), %s513_s25, 128  }
 0x1b2   : > { %906 = vsyncadd (!%p731_p11), %s513_s25, 4294967168  ;;  %s522_s1 = scalar_lea.sflag [#allocation5], %s512_s24 }
 0x1b3   : > { %908 = dma.done.wait (!%p731_p11), %s522_s1, 128  }
 0x1b4   : > { %910 = vsyncadd (!%p731_p11), %s522_s1, 4294967168  ;;  %s23_s28 = sadd.s32 1, %s941_s28   ;;  %s1244_s21 = smov %s917_s22 }
 0x1b5   : > { %p20_p12 = scmp.ge.s32.totalorder %s23_s28, 6   ;;  %s1245_s22 = smov %s921_s23 }
 0x1b6   : > { %s1246_s23 = smov %s1058_s15  ;;  %s1247_s24 = smov %s933_s26 }
 0x1b7   : > { %s1248_s25 = smov %s937_s27  ;;  %s1249_s26 = smov %s1252_s7 }
 0x1b8   : > { %s1250_s27 = smov %s1256_s8  ;;  %22 = sbr.rel (!%p20_p12) target bundleno = 11 (0xb), region = 95 }
 0x1bf   :  { %527 = vsyncpa [#allocation3], 1 }
 0x1c0   :  { %529 = vsyncpa [#allocation3 + $0x1], 1 }
 0x1c1   :  { %530 = vsyncpa [#allocation5], 1 }
 0x1c2   :  { %532 = vsyncpa [#allocation5 + $0x1], 1 }

</bundles_post_ra>
